<compile_context>
chip_gen: v6e
topology: v6e:2x2x1
jax: 0.10.0
libtpu: 0.0.40
codegen_flags: <defaults>
</compile_context>

<pallas_src>
import jax
import jax.numpy as jnp
from jax.experimental import pallas as pl
from jax.experimental.pallas import tpu as pltpu

EPS = 1e-10
MOMENTUM = 0.1


def _choose_row_tile(rows):
    """Sublane-packed row tile (multiple of 8), capped for VMEM friendliness."""
    if rows % 8 != 0:
        return rows                       # full-extent block is always legal
    for cand in (64, 32, 16, 8):
        if rows % cand == 0:
            return cand
    return 8


def _choose_lane_tile(length):
    """Lane-dense tile (multiple of 128), capped at 2048 lanes."""
    if length % 128 != 0:
        return length                     # full-extent block is always legal
    for cand in (2048, 1024, 512, 256, 128):
        if length % cand == 0:
            return cand
    return 128


def _stats_kernel(x_ref, sum_ref, m2_ref):
    """Per-row running sum and centered M2, accumulated across lane tiles."""
    j = pl.program_id(1)

    @pl.when(j == 0)
    def _():
        sum_ref[...] = jnp.zeros_like(sum_ref)
        m2_ref[...] = jnp.zeros_like(m2_ref)

    x = x_ref[...]                                    # (ROWS, LT) f32
    lt = x.shape[1]

    tile_sum = jnp.sum(x, axis=1, keepdims=True)      # (ROWS, 1)
    tile_mean = tile_sum * (1.0 / lt)
    d = x - tile_mean
    tile_m2 = jnp.sum(d * d, axis=1, keepdims=True)   # centered within tile

    # Chan/Welford chunk merge with the running accumulator.
    n_a = (j * lt).astype(jnp.float32)                # elements seen so far
    n_b = jnp.float32(lt)
    prev_sum = sum_ref[...]
    prev_mean = prev_sum / jnp.maximum(n_a, 1.0)      # == 0 when j == 0
    delta = tile_mean - prev_mean
    m2_ref[...] = m2_ref[...] + tile_m2 + delta * delta * (n_a * n_b / (n_a + n_b))
    sum_ref[...] = prev_sum + tile_sum


def _normalize_kernel(x_ref, scale_ref, shift_ref, o_ref):
    """out = x * scale + shift  (per-row folded affine, 2 VALU ops/element)."""
    o_ref[...] = x_ref[...] * scale_ref[...] + shift_ref[...]


@jax.jit
def batch_norm_2d(x_nchw, weight, bias, running_mean, running_var):
    """Training-mode BatchNorm2d forward (matches the custom module).

    x_nchw:       (N, C, H, W) float32
    weight, bias: (1, C, 1, 1) float32
    running_*:    (1, C, 1, 1) float32 (buffers; updated and returned)
    """
    N, C, H, W = x_nchw.shape
    R = N * C                      # rows: one per (n, c) slice
    Lrow = H * W                   # per-row reduction length
    Ltot = N * H * W               # per-channel element count

    # Free view (row-major contiguity): no transpose, no copy.
    x2d = x_nchw.reshape(R, Lrow).astype(jnp.float32)

    ROWS = _choose_row_tile(R)
    LT = _choose_lane_tile(Lrow)
    grid = (R // ROWS, Lrow // LT)

    # ---- pass 1: per-row partial statistics (1 read of x) -------------------
    row_sum, row_m2 = pl.pallas_call(
        _stats_kernel,
        out_shape=(
            jax.ShapeDtypeStruct((R, 1), jnp.float32),
            jax.ShapeDtypeStruct((R, 1), jnp.float32),
        ),
        grid_spec=pltpu.PrefetchScalarGridSpec(
            num_scalar_prefetch=0,
            grid=grid,
            in_specs=[pl.BlockSpec((ROWS, LT), lambda i, j: (i, j))],
            out_specs=[
                pl.BlockSpec((ROWS, 1), lambda i, j: (i, 0)),
                pl.BlockSpec((ROWS, 1), lambda i, j: (i, 0)),
            ],
        ),
        compiler_params=pltpu.CompilerParams(
            dimension_semantics=("parallel", "arbitrary")),
        cost_estimate=pl.CostEstimate(
            flops=4 * R * Lrow, transcendentals=0,
            bytes_accessed=R * Lrow * 4 + 2 * R * 4),
    )(x2d)

    # ---- tiny per-channel combine + affine fold (plain-JAX glue) ------------
    row_sum_nc = row_sum.reshape(N, C)
    row_m2_nc = row_m2.reshape(N, C)
    ch_sum = jnp.sum(row_sum_nc, axis=0)                       # (C,)
    mean_c = ch_sum / Ltot
    row_mean = row_sum_nc / Lrow                               # (N, C)
    ch_m2 = (jnp.sum(row_m2_nc, axis=0)
             + Lrow * jnp.sum((row_mean - mean_c[None, :]) ** 2, axis=0))
    var_c = ch_m2 / max(Ltot - 1, 1)          # unbiased, as torch.var default

    inv_std = jax.lax.rsqrt(var_c + jnp.float32(EPS))
    w_c = weight.reshape(C).astype(jnp.float32)
    b_c = bias.reshape(C).astype(jnp.float32)
    scale_c = w_c * inv_std
    shift_c = b_c - mean_c * scale_c
    scale_r = jnp.tile(scale_c, (N,)).reshape(R, 1)            # per-row scale
    shift_r = jnp.tile(shift_c, (N,)).reshape(R, 1)            # per-row shift

    # ---- pass 2: normalize (1 read + 1 write of x) ---------------------------
    out2d = pl.pallas_call(
        _normalize_kernel,
        out_shape=jax.ShapeDtypeStruct((R, Lrow), jnp.float32),
        grid_spec=pltpu.PrefetchScalarGridSpec(
            num_scalar_prefetch=0,
            grid=grid,
            in_specs=[
                pl.BlockSpec((ROWS, LT), lambda i, j: (i, j)),
                pl.BlockSpec((ROWS, 1), lambda i, j: (i, 0)),
                pl.BlockSpec((ROWS, 1), lambda i, j: (i, 0)),
            ],
            out_specs=pl.BlockSpec((ROWS, LT), lambda i, j: (i, j)),
        ),
        compiler_params=pltpu.CompilerParams(
            dimension_semantics=("parallel", "parallel")),
        cost_estimate=pl.CostEstimate(
            flops=2 * R * Lrow, transcendentals=0,
            bytes_accessed=2 * R * Lrow * 4 + 2 * R * 4),
    )(x2d, scale_r, shift_r)

    out = out2d.reshape(N, C, H, W)            # free view back to NCHW

    # running-stat buffer updates (module state, not part of the forward math)
    mean4 = mean_c.reshape(1, C, 1, 1)
    var4 = var_c.reshape(1, C, 1, 1)
    new_running_mean = MOMENTUM * mean4 + (1.0 - MOMENTUM) * running_mean
    new_running_var = MOMENTUM * var4 + (1.0 - MOMENTUM) * running_var
    return out, new_running_mean, new_running_var


if __name__ == "__main__":
    key = jax.random.PRNGKey(0)
    kx, kw, kb = jax.random.split(key, 3)
    N, C, H, W = 2, 4, 16, 16

    x = jax.random.normal(kx, (N, C, H, W), dtype=jnp.float32)
    # non-trivial affine parameters to exercise the scale/shift folding
    weight = 1.0 + 0.1 * jax.random.normal(kw, (1, C, 1, 1), dtype=jnp.float32)
    bias = 0.1 * jax.random.normal(kb, (1, C, 1, 1), dtype=jnp.float32)
    running_mean = jnp.zeros((1, C, 1, 1), dtype=jnp.float32)
    running_var = jnp.ones((1, C, 1, 1), dtype=jnp.float32)

    out, new_rm, new_rv = batch_norm_2d(x, weight, bias, running_mean, running_var)
    out = jax.block_until_ready(out)

    # pure-JAX reference (module semantics: unbiased var, eps = 1e-10)
    mean_ref = jnp.mean(x, axis=(0, 2, 3), keepdims=True)
    var_ref = jnp.var(x, axis=(0, 2, 3), keepdims=True, ddof=1)
    ref = weight * (x - mean_ref) / jnp.sqrt(var_ref + EPS) + bias
    assert jnp.max(jnp.abs(out - ref)) < 1e-4, "output mismatch vs reference"

    rm_ref = MOMENTUM * mean_ref + (1.0 - MOMENTUM) * running_mean
    rv_ref = MOMENTUM * var_ref + (1.0 - MOMENTUM) * running_var
    assert jnp.max(jnp.abs(new_rm - rm_ref)) < 1e-5, "running_mean mismatch"
    assert jnp.max(jnp.abs(new_rv - rv_ref)) < 1e-5, "running_var mismatch"

    print("KERNEL_OK")
</pallas_src>

<mosaic_0001>
module attributes {stable_mosaic.version = 11 : i64} {
  func.func @_stats_kernel(%arg0: i32, %arg1: i32, %arg2: memref<8x256xf32, #tpu.memory_space<vmem>>, %arg3: memref<8x1xf32, #tpu.memory_space<vmem>>, %arg4: memref<8x1xf32, #tpu.memory_space<vmem>>) attributes {dimension_semantics = [#tpu.dimension_semantics<parallel>, #tpu.dimension_semantics<arbitrary>], iteration_bounds = array<i64: 1, 1>, scalar_prefetch = 0 : i64, scratch_operands = 0 : i64, tpu.core_type = #tpu.core_type<tc>, window_params = [{transform_indices = @transform_0, window_bounds = array<i64: 8, 256>}, {transform_indices = @transform_1, window_bounds = array<i64: 8, 1>}, {transform_indices = @transform_2, window_bounds = array<i64: 8, 1>}]} {
    %c0_i32 = arith.constant 0 : i32
    %0 = arith.cmpi eq, %arg1, %c0_i32 : i32
    %1 = arith.extui %0 : i1 to i32
    %c0_i32_0 = arith.constant 0 : i32
    %2 = arith.cmpi ne, %1, %c0_i32_0 : i32
    scf.if %2 {
      %cst_15 = arith.constant 0.000000e+00 : f32
      %32 = vector.broadcast %cst_15 : f32 to vector<8x1xf32>
      %c0_16 = arith.constant 0 : index
      %c0_17 = arith.constant 0 : index
      %33 = vector.load %arg3[%c0_16, %c0_17] : memref<8x1xf32, #tpu.memory_space<vmem>>, vector<8x1xf32>
      tpu.vector_store %arg3[%c0_16, %c0_17], %32 {strides = array<i32>} : memref<8x1xf32, #tpu.memory_space<vmem>>, vector<8x1xf32>,
      %cst_18 = arith.constant 0.000000e+00 : f32
      %34 = vector.broadcast %cst_18 : f32 to vector<8x1xf32>
      %c0_19 = arith.constant 0 : index
      %c0_20 = arith.constant 0 : index
      %35 = vector.load %arg4[%c0_19, %c0_20] : memref<8x1xf32, #tpu.memory_space<vmem>>, vector<8x1xf32>
      tpu.vector_store %arg4[%c0_19, %c0_20], %34 {strides = array<i32>} : memref<8x1xf32, #tpu.memory_space<vmem>>, vector<8x1xf32>,
    } else {
    }
    %c0 = arith.constant 0 : index
    %c0_1 = arith.constant 0 : index
    %3 = vector.load %arg2[%c0, %c0_1] : memref<8x256xf32, #tpu.memory_space<vmem>>, vector<8x256xf32>
    %cst = arith.constant dense<0.000000e+00> : vector<8xf32>
    %4 = vector.multi_reduction <add>, %3, %cst [1] : vector<8x256xf32> to vector<8xf32>
    %5 = vector.shape_cast %4 : vector<8xf32> to vector<8x1xf32>
    %cst_2 = arith.constant 3.906250e-03 : f32
    %6 = vector.broadcast %cst_2 : f32 to vector<8x1xf32>
    %7 = arith.mulf %5, %6 : vector<8x1xf32>
    %8 = vector.broadcast %7 : vector<8x1xf32> to vector<8x256xf32>
    %9 = arith.subf %3, %8 : vector<8x256xf32>
    %10 = arith.mulf %9, %9 : vector<8x256xf32>
    %cst_3 = arith.constant dense<0.000000e+00> : vector<8xf32>
    %11 = vector.multi_reduction <add>, %10, %cst_3 [1] : vector<8x256xf32> to vector<8xf32>
    %12 = vector.shape_cast %11 : vector<8xf32> to vector<8x1xf32>
    %c256_i32 = arith.constant 256 : i32
    %13 = arith.muli %arg1, %c256_i32 : i32
    %14 = arith.sitofp %13 : i32 to f32
    %c0_4 = arith.constant 0 : index
    %c0_5 = arith.constant 0 : index
    %15 = vector.load %arg3[%c0_4, %c0_5] : memref<8x1xf32, #tpu.memory_space<vmem>>, vector<8x1xf32>
    %cst_6 = arith.constant 1.000000e+00 : f32
    %16 = arith.maximumf %14, %cst_6 : f32
    %17 = vector.broadcast %16 : f32 to vector<8x1xf32>
    %18 = arith.divf %15, %17 : vector<8x1xf32>
    %19 = arith.subf %7, %18 : vector<8x1xf32>
    %c0_7 = arith.constant 0 : index
    %c0_8 = arith.constant 0 : index
    %20 = vector.load %arg4[%c0_7, %c0_8] : memref<8x1xf32, #tpu.memory_space<vmem>>, vector<8x1xf32>
    %21 = arith.addf %20, %12 : vector<8x1xf32>
    %22 = arith.mulf %19, %19 : vector<8x1xf32>
    %cst_9 = arith.constant 2.560000e+02 : f32
    %23 = arith.mulf %14, %cst_9 : f32
    %cst_10 = arith.constant 2.560000e+02 : f32
    %24 = arith.addf %14, %cst_10 : f32
    %25 = arith.divf %23, %24 : f32
    %26 = vector.broadcast %25 : f32 to vector<8x1xf32>
    %27 = arith.mulf %22, %26 : vector<8x1xf32>
    %28 = arith.addf %21, %27 : vector<8x1xf32>
    %c0_11 = arith.constant 0 : index
    %c0_12 = arith.constant 0 : index
    %29 = vector.load %arg4[%c0_11, %c0_12] : memref<8x1xf32, #tpu.memory_space<vmem>>, vector<8x1xf32>
    tpu.vector_store %arg4[%c0_11, %c0_12], %28 {strides = array<i32>} : memref<8x1xf32, #tpu.memory_space<vmem>>, vector<8x1xf32>,
    %30 = arith.addf %15, %5 : vector<8x1xf32>
    %c0_13 = arith.constant 0 : index
    %c0_14 = arith.constant 0 : index
    %31 = vector.load %arg3[%c0_13, %c0_14] : memref<8x1xf32, #tpu.memory_space<vmem>>, vector<8x1xf32>
    tpu.vector_store %arg3[%c0_13, %c0_14], %30 {strides = array<i32>} : memref<8x1xf32, #tpu.memory_space<vmem>>, vector<8x1xf32>,
    return
  }
  func.func @transform_0(%arg0: i32, %arg1: i32) -> (i32, i32) {
    %c0_i32 = arith.constant 0 : i32
    return %arg0, %arg1 : i32, i32
  }
  func.func @transform_1(%arg0: i32, %arg1: i32) -> (i32, i32) {
    %c0_i32 = arith.constant 0 : i32
    %c0_i32_0 = arith.constant 0 : i32
    return %arg0, %c0_i32 : i32, i32
  }
  func.func @transform_2(%arg0: i32, %arg1: i32) -> (i32, i32) {
    %c0_i32 = arith.constant 0 : i32
    %c0_i32_0 = arith.constant 0 : i32
    return %arg0, %c0_i32 : i32, i32
  }
}

module attributes {stable_mosaic.version = 11 : i64} {
  func.func @_normalize_kernel(%arg0: i32, %arg1: i32, %arg2: memref<8x256xf32, #tpu.memory_space<vmem>>, %arg3: memref<8x1xf32, #tpu.memory_space<vmem>>, %arg4: memref<8x1xf32, #tpu.memory_space<vmem>>, %arg5: memref<8x256xf32, #tpu.memory_space<vmem>>) attributes {dimension_semantics = [#tpu.dimension_semantics<parallel>, #tpu.dimension_semantics<parallel>], iteration_bounds = array<i64: 1, 1>, scalar_prefetch = 0 : i64, scratch_operands = 0 : i64, tpu.core_type = #tpu.core_type<tc>, window_params = [{transform_indices = @transform_0, window_bounds = array<i64: 8, 256>}, {transform_indices = @transform_1, window_bounds = array<i64: 8, 1>}, {transform_indices = @transform_2, window_bounds = array<i64: 8, 1>}, {transform_indices = @transform_3, window_bounds = array<i64: 8, 256>}]} {
    %c0 = arith.constant 0 : index
    %c0_0 = arith.constant 0 : index
    %0 = vector.load %arg2[%c0, %c0_0] : memref<8x256xf32, #tpu.memory_space<vmem>>, vector<8x256xf32>
    %c0_1 = arith.constant 0 : index
    %c0_2 = arith.constant 0 : index
    %1 = vector.load %arg3[%c0_1, %c0_2] : memref<8x1xf32, #tpu.memory_space<vmem>>, vector<8x1xf32>
    %2 = vector.broadcast %1 : vector<8x1xf32> to vector<8x256xf32>
    %3 = arith.mulf %0, %2 : vector<8x256xf32>
    %c0_3 = arith.constant 0 : index
    %c0_4 = arith.constant 0 : index
    %4 = vector.load %arg4[%c0_3, %c0_4] : memref<8x1xf32, #tpu.memory_space<vmem>>, vector<8x1xf32>
    %5 = vector.broadcast %4 : vector<8x1xf32> to vector<8x256xf32>
    %6 = arith.addf %3, %5 : vector<8x256xf32>
    %c0_5 = arith.constant 0 : index
    %c0_6 = arith.constant 0 : index
    %7 = vector.load %arg5[%c0_5, %c0_6] : memref<8x256xf32, #tpu.memory_space<vmem>>, vector<8x256xf32>
    tpu.vector_store %arg5[%c0_5, %c0_6], %6 {strides = array<i32>} : memref<8x256xf32, #tpu.memory_space<vmem>>, vector<8x256xf32>,
    return
  }
  func.func @transform_0(%arg0: i32, %arg1: i32) -> (i32, i32) {
    %c0_i32 = arith.constant 0 : i32
    return %arg0, %arg1 : i32, i32
  }
  func.func @transform_1(%arg0: i32, %arg1: i32) -> (i32, i32) {
    %c0_i32 = arith.constant 0 : i32
    %c0_i32_0 = arith.constant 0 : i32
    return %arg0, %c0_i32 : i32, i32
  }
  func.func @transform_2(%arg0: i32, %arg1: i32) -> (i32, i32) {
    %c0_i32 = arith.constant 0 : i32
    %c0_i32_0 = arith.constant 0 : i32
    return %arg0, %c0_i32 : i32, i32
  }
  func.func @transform_3(%arg0: i32, %arg1: i32) -> (i32, i32) {
    %c0_i32 = arith.constant 0 : i32
    return %arg0, %arg1 : i32, i32
  }
}

</mosaic_0001>

<bundles_post_ra>
// kernel: tile.18
= control target key start
LH: loop header
LB: loop body
LE: loop exit
PB: predicated region body
PF: predicated region fallthrough
CT: control target
= control target key end

     0   :  { %s22_s0 = inlined_call_operand.vmem [shape: f32[4], index: 0, kind: input, shape index: {}]   ;;  %s23_s1 = inlined_call_operand.vmem [shape: f32[2,4], index: 1, kind: output, shape index: {}]  }
   0x1   :  { %v4_v0 = vld [vmem:[%s22_s0] ss:$0 sm:$0xff] }
   0x2   :  { %5 = vst [vmem:[%s23_s1] sm:$0x3] %v4_v0 }

// kernel: tile.0
= control target key start
LH: loop header
LB: loop body
LE: loop exit
PB: predicated region body
PF: predicated region fallthrough
CT: control target
= control target key end

     0   :  { %s35_s8 = smov 125   ;;  %vm8_vm0 = vcmask 7168   ;;  %s36_s11 = smov 126   ;;  %s62_s0 = inlined_call_operand.vmem [shape: f32[2,4], index: 0, kind: input, shape index: {}]   ;;  %s63_s1 = inlined_call_operand.vmem [shape: f32[8,1], index: 1, kind: output, shape index: {}]  }
   0x1   :  { %v5_v0 = vld [vmem:[%s62_s0] sm:$0x3]  ;;  %s34_s0 = smov 127  }
   0x2   :  { %6 = vst [vmem:[#allocation0] sm:$0x3] %v5_v0 }
   0x9   :  { %v10_v1 = vld [vmem:[#allocation0] sm:$0x3]  }
   0xa   :  { %v22_v2 = vld [vmem:[#allocation0] sm:$0x3]   ;;  %11 = vrot.lane.b32.xlu0 %v10_v1, %s34_s0 }
   0xb   :  { %23 = vrot.lane.b32.xlu1 %v22_v2, %s35_s8  ;;  %v7_v3 = vld [vmem:[#allocation0] sm:$0x3]  }
   0xc   :  { %v16_v4 = vld [vmem:[#allocation0] sm:$0x3]   ;;  %9 = vst.msk [vmem:[%s63_s1] ss:$4 sm:$0x3] %vm8_vm0, %v7_v3  }
   0xe   :  { %17 = vrot.lane.b32.xlu0 %v16_v4, %s36_s11 }
  0x7c   :  { %v12_v5 = vpop.permute.xlu0 %11  }
  0x7d   :  { %v24_v6 = vpop.permute.xlu1 %23   ;;  %28 = vst.msk [vmem:[%s63_s1 + $0x1] ss:$4 sm:$0x3] %vm8_vm0, %v12_v5  }
  0x7e   :  { %30 = vst.msk [vmem:[%s63_s1 + $0x3] ss:$4 sm:$0x3] %vm8_vm0, %v24_v6  }
  0x80   :  { %v18_v7 = vpop.permute.xlu0 %17  }
  0x81   :  { %29 = vst.msk [vmem:[%s63_s1 + $0x2] ss:$4 sm:$0x3] %vm8_vm0, %v18_v7  }

// kernel: batch_norm_2d.2
= control target key start
LH: loop header
LB: loop body
LE: loop exit
PB: predicated region body
PF: predicated region fallthrough
CT: control target
= control target key end

     0   :  { %vm14_vm0 = vcmask 7168   ;;  %v63_v2 = vmov 0.0   ;;  %s107_s0 = inlined_call_operand.vmem [shape: f32[8,256], index: 0, kind: input, shape index: {}]   ;;  %s108_s1 = inlined_call_operand.vmem [shape: f32[8,1], index: 1, kind: output, shape index: {0}]   ;;  %s109_s2 = inlined_call_operand.vmem [shape: f32[8,1], index: 2, kind: output, shape index: {1}]  }
   0x1   :  { %v17_v0 = vld [vmem:[%s107_s0] sm:$0xff]  ;;  %v18_v1 = vld [vmem:[%s107_s0 + $0x8] sm:$0xff]  ;;  %15 = vst.msk [vmem:[%s108_s1] sm:$0xff] %vm14_vm0, %v63_v2  ;;  %16 = vst.msk [vmem:[%s109_s2] sm:$0xff] %vm14_vm0, %v63_v2 }
   0x2   :  { %v19_v3 = vadd.f32 %v18_v1, %v17_v0 }
   0x4   :  { %20 = vadd.xlane.f32.xlu0 %v19_v3 }
   0x8   :  { %v32_v4 = vld [vmem:[%s108_s1] sm:$0xff] }
   0x9   :  { %v38_v15 = vld [vmem:[%s109_s2] sm:$0xff] }
  0x8d   :  { %v21_v5 = vpop.xlane.xlu0 %20 }
  0x8e   :  { %v22_v6 = vmul.f32 0.00390625, %v21_v5  ;;  %v52_v7 = vadd.f32 %v32_v4, %v21_v5 }
  0x90   :  { %53 = vst.msk [vmem:[%s108_s1] sm:$0xff] %vm14_vm0, %v52_v7  ;;  %v23_v8 = vsub.f32 %v17_v0, %v22_v6  ;;  %v24_v9 = vsub.f32 %v18_v1, %v22_v6  ;;  %v37_v10 = vsub.f32 %v22_v6, %v32_v4 }
  0x92   :  { %v25_v11 = vmul.f32 %v23_v8, %v23_v8  ;;  %v26_v12 = vmul.f32 %v24_v9, %v24_v9  ;;  %v40_v14 = vmul.f32 %v37_v10, %v37_v10 }
  0x94   :  { %v27_v13 = vadd.f32 %v26_v12, %v25_v11  ;;  %v48_v17 = vmul.f32 0.0, %v40_v14 }
  0x96   :  { %28 = vadd.xlane.f32.xlu0 %v27_v13 }
 0x11f   :  { %v29_v16 = vpop.xlane.xlu0 %28 }
 0x120   :  { %v39_v18 = vadd.f32 %v38_v15, %v29_v16 }
 0x122   :  { %v49_v19 = vadd.f32 %v48_v17, %v39_v18 }
 0x124   :  { %51 = vst.msk [vmem:[%s109_s2] sm:$0xff] %vm14_vm0, %v49_v19 }

// kernel: batch_norm_2d.3
= control target key start
LH: loop header
LB: loop body
LE: loop exit
PB: predicated region body
PF: predicated region fallthrough
CT: control target
= control target key end

     0   :  { %v40_v0 = vmov 0   ;;  %s79_s1 = inlined_call_operand.vmem [shape: f32[8,1], index: 1, kind: input, shape index: {}]   ;;  %s80_s2 = inlined_call_operand.vmem [shape: f32[8,1], index: 2, kind: input, shape index: {}]   ;;  %s81_s0 = inlined_call_operand.vmem [shape: f32[8,256], index: 0, kind: input, shape index: {}]   ;;  %s82_s3 = inlined_call_operand.vmem [shape: f32[8,256], index: 3, kind: output, shape index: {}]  }
   0x1   :  { %39 = vset.pattern.permute.xlu0 %v40_v0  ;;  %v16_v1 = vld [vmem:[%s79_s1] sm:$0xff]  ;;  %v15_v5 = vld [vmem:[%s81_s0 + $0x8] sm:$0xff] }
   0x2   :  { %19 = vperm.xlu0 %39, %v16_v1   ;;  %v24_v2 = vld [vmem:[%s80_s2] sm:$0xff] }
   0x3   :  { %v14_v4 = vld [vmem:[%s81_s0] sm:$0xff] }
   0x6   :  { %27 = vperm.xlu0 %39, %v24_v2  }
  0x7d   :  { %v20_v3 = vpop.permute.xlu0 %19 }
  0x7e   :  { %v22_v6 = vmul.f32 %v20_v3, %v14_v4  ;;  %v23_v7 = vmul.f32 %v20_v3, %v15_v5 }
  0x81   :  { %v28_v8 = vpop.permute.xlu0 %27 }
  0x82   :  { %v30_v9 = vadd.f32 %v28_v8, %v22_v6  ;;  %v31_v10 = vadd.f32 %v28_v8, %v23_v7 }
  0x84   :  { %32 = vst [vmem:[%s82_s3] sm:$0xff] %v30_v9  ;;  %33 = vst [vmem:[%s82_s3 + $0x8] sm:$0xff] %v31_v10 }

</bundles_post_ra>
